<compile_context>
chip_gen: v7x
topology: tpu7x:2x2x1
jax: 0.10.0
libtpu: 0.0.40
codegen_flags: <defaults>
</compile_context>

<pallas_src>
import jax
import jax.numpy as jnp
from jax.experimental import pallas as pl
from jax.experimental.pallas import tpu as pltpu


def _id_kernel(x_hbm_ref, o_hbm_ref, flag_ref):
    # Output aliases input at the buffer level, so the identity is already
    # satisfied: there is nothing to move.  The single SMEM scalar store below
    # is a trivially cheap op that keeps the kernel body non-empty for Mosaic
    # lowering; it touches neither HBM operand.
    del x_hbm_ref, o_hbm_ref
    flag_ref[0] = jnp.int32(1)


def id_module_forward(x: jax.Array) -> jax.Array:
    """Pallas implementation of IDModule.forward(x) -> x (zero-copy identity)."""
    return pl.pallas_call(
        _id_kernel,
        out_shape=jax.ShapeDtypeStruct(x.shape, x.dtype),
        # Leave both operands wherever they already live (HBM); no auto-DMA,
        # no VMEM staging, no per-tile pipeline bookkeeping.
        in_specs=[pl.BlockSpec(memory_space=pl.ANY)],
        out_specs=pl.BlockSpec(memory_space=pl.ANY),
        scratch_shapes=[pltpu.SMEM((1,), jnp.int32)],
        # Output 0 aliases input 0 -> no output allocation, no copy emitted
        # by the kernel itself.
        input_output_aliases={0: 0},
        # Advisory: this call is free (0 FLOPs, 0 bytes of HBM traffic).
        cost_estimate=pl.CostEstimate(flops=0, transcendentals=0,
                                      bytes_accessed=0),
    )(x)


if __name__ == "__main__":
    # IDModule.__init__ declares no parameters; the input is the only state.
    key = jax.random.PRNGKey(0)
    shape, dtype = (2, 4, 16, 16), jnp.float32
    x = jax.random.normal(key, shape, dtype=dtype)

    y = id_module_forward(x)
    y = jax.block_until_ready(y)

    # Regenerate the expected values deterministically instead of reusing `x`:
    # with input/output aliasing the input buffer may be donated to the output.
    expected = jax.random.normal(key, shape, dtype=dtype)

    assert y.shape == shape and y.dtype == dtype
    assert bool(jnp.all(y == expected))
    print("KERNEL_OK")
</pallas_src>

<mosaic_0001>
module attributes {stable_mosaic.version = 11 : i64} {
  func.func @_id_kernel(%arg0: memref<2x4x16x16xf32, #tpu.memory_space<any>>, %arg1: memref<2x4x16x16xf32, #tpu.memory_space<any>>, %arg2: memref<1xi32, #tpu.memory_space<smem>>) attributes {dimension_semantics = [], scalar_prefetch = 0 : i64, scratch_operands = 1 : i64, tpu.core_type = #tpu.core_type<tc>} {
    %c1_i32 = arith.constant 1 : i32
    %c0 = arith.constant 0 : index
    %0 = memref.load %arg2[%c0] : memref<1xi32, #tpu.memory_space<smem>>
    memref.store %c1_i32, %arg2[%c0] : memref<1xi32, #tpu.memory_space<smem>>
    return
  }
}

</mosaic_0001>

<bundles_post_ra>
// kernel: tpu_custom_call.1
= control target key start
LH: loop header
LB: loop body
LE: loop exit
PB: predicated region body
PF: predicated region fallthrough
CT: control target
= control target key end

     0   :  { %s18_s0 = inlined_call_operand.hbm [shape: f32[2,4,16,16], index: 0, kind: input, shape index: {}, may-alias: {0,1}]   ;;  %s19_s1 = inlined_call_operand.hbm [shape: f32[2,4,16,16], index: 1, kind: output, shape index: {}, may-alias: {0,1}]  }

</bundles_post_ra>
